<compile_context>
chip_gen: v6e
topology: v6e:2x2x1
jax: 0.10.0
libtpu: 0.0.40
codegen_flags: <defaults>
</compile_context>

<pallas_src>
import jax
import jax.numpy as jnp
from jax.experimental import pallas as pl
from jax.experimental.pallas import tpu as pltpu


def _round_up(x, m):
    return ((x + m - 1) // m) * m


def _matmul_kernel_single(x_ref, qt_ref, o_ref):
    """out = x @ qt when the whole K reduction fits in one tile."""
    o_ref[...] = jnp.dot(
        x_ref[...], qt_ref[...], preferred_element_type=jnp.float32
    ).astype(o_ref.dtype)


def _matmul_kernel_acc(x_ref, qt_ref, o_ref):
    """out = x @ qt with K as the trailing "arbitrary" grid axis.

    The output BlockSpec ignores k, so the f32 output tile stays resident in
    VMEM across the K reduction and doubles as the accumulator (no scratch)."""
    @pl.when(pl.program_id(2) == 0)
    def _():
        o_ref[...] = jnp.zeros_like(o_ref)

    o_ref[...] += jnp.dot(
        x_ref[...], qt_ref[...], preferred_element_type=jnp.float32
    )


def direction_matmul(x, qt, *, tb_pref=1024, tm_pref=1024, tk_pref=512):
    """Pallas: (B, K) @ (K, M) -> (B, M); bf16 MXU inputs, f32 accumulation."""
    B, K = x.shape
    K2, M = qt.shape
    assert K == K2, (x.shape, qt.shape)

    # bf16 is the native MXU input dtype on all generations and halves DMA bytes.
    x = x.astype(jnp.bfloat16)
    qt = qt.astype(jnp.bfloat16)

    # Aligned tile sizes bounded by the preferred sizes (sublane axes multiple
    # of 8, lane axes multiple of 128).  Operands are zero-padded so every tile
    # is full: uniform lane-dense stores, no full-dim fallback tiles that could
    # blow the scoped VMEM limit.
    tb = min(tb_pref, _round_up(B, 8))
    tm = min(tm_pref, _round_up(M, 128))
    tk = min(tk_pref, _round_up(K, 128))
    Bp = _round_up(B, tb)
    Mp = _round_up(M, tm)
    Kp = _round_up(K, tk)

    # v7x has 2 TensorCores per chip: keep at least 2 tiles on a parallel axis
    # when possible so megacore sharding has work to split.
    if Bp // tb == 1 and Mp // tm == 1:
        if Mp >= 256 and (Mp // 2) % 128 == 0:
            tm = Mp // 2
        elif Bp >= 16 and (Bp // 2) % 8 == 0:
            tb = Bp // 2

    if (Bp, Kp) != (B, K):
        x = jnp.pad(x, ((0, Bp - B), (0, Kp - K)))
    if (Kp, Mp) != (K, M):
        qt = jnp.pad(qt, ((0, Kp - K), (0, Mp - M)))

    nk = Kp // tk
    cost = pl.CostEstimate(
        flops=2 * B * K * M,
        transcendentals=0,
        bytes_accessed=B * K * 2 + K * M * 2 + B * M * 4,
    )

    if nk == 1:
        out = pl.pallas_call(
            _matmul_kernel_single,
            out_shape=jax.ShapeDtypeStruct((Bp, Mp), jnp.float32),
            grid_spec=pltpu.PrefetchScalarGridSpec(
                num_scalar_prefetch=0,
                grid=(Bp // tb, Mp // tm),
                in_specs=[
                    pl.BlockSpec((tb, tk), lambda i, j: (i, 0)),
                    pl.BlockSpec((tk, tm), lambda i, j: (0, j)),
                ],
                out_specs=pl.BlockSpec((tb, tm), lambda i, j: (i, j)),
            ),
            compiler_params=pltpu.CompilerParams(
                dimension_semantics=("parallel", "parallel"),
                vmem_limit_bytes=32 * 1024 * 1024,
            ),
            cost_estimate=cost,
        )(x, qt)
    else:
        out = pl.pallas_call(
            _matmul_kernel_acc,
            out_shape=jax.ShapeDtypeStruct((Bp, Mp), jnp.float32),
            grid_spec=pltpu.PrefetchScalarGridSpec(
                num_scalar_prefetch=0,
                grid=(Bp // tb, Mp // tm, nk),
                in_specs=[
                    pl.BlockSpec((tb, tk), lambda i, j, k: (i, k)),
                    pl.BlockSpec((tk, tm), lambda i, j, k: (k, j)),
                ],
                out_specs=pl.BlockSpec((tb, tm), lambda i, j, k: (i, j)),
            ),
            compiler_params=pltpu.CompilerParams(
                dimension_semantics=("parallel", "parallel", "arbitrary"),
                vmem_limit_bytes=32 * 1024 * 1024,
            ),
            cost_estimate=cost,
        )(x, qt)

    if (Bp, Mp) != (B, M):
        out = out[:B, :M]
    return out


# Below this many multiply-adds, pallas_call launch + per-step overhead beats
# the work; a plain XLA dot is strictly faster (this covers the module's
# real tiny configuration).
_SMALL_PROBLEM_MAC_LIMIT = 1 << 18


def direction_forward(weight, input=None):
    """JAX/Pallas equivalent of Direction.forward."""
    # TODO(synk): Householder QR is a sequential LAPACK-style factorization with
    # no clean Pallas equivalent; it runs via jnp.linalg.qr on the small (m, n)
    # parameter while the batched hot path runs in the Pallas kernel.
    w = weight.astype(jnp.float32) + 1e-8
    Q, _ = jnp.linalg.qr(w)                      # (m, k), k = min(m, n)
    if input is None:
        return Q

    # diag_embed(input) @ Q.T summed over dim=1  ==  input @ Q.T
    lead = input.shape[:-1]
    K = input.shape[-1]
    M = Q.shape[0]
    x2 = input.reshape((-1, K))
    B = x2.shape[0]
    qt = jnp.transpose(Q)

    if B * K * M < _SMALL_PROBLEM_MAC_LIMIT:
        out = jnp.dot(x2.astype(jnp.float32), qt,
                      preferred_element_type=jnp.float32)
    else:
        out = direction_matmul(x2, qt)
    return out.reshape(lead + (M,))


def _reference_forward(weight, input=None):
    """Literal translation of the PyTorch module (diag_embed path)."""
    w = weight.astype(jnp.float32) + 1e-8
    Q, _ = jnp.linalg.qr(w)
    if input is None:
        return Q
    input_diag = jax.vmap(jnp.diag)(input.astype(jnp.float32))   # (B, k, k)
    out = jnp.matmul(input_diag, jnp.transpose(Q))               # (B, k, m)
    return jnp.sum(out, axis=1)                                  # (B, m)


if __name__ == "__main__":
    key = jax.random.PRNGKey(0)
    kw, kx, kw2, kx2 = jax.random.split(key, 4)

    # Shapes consistent with the module: weight (m, n) = (32, 16), Q is
    # (32, 16), input rows have length k = 16, batch = 2.  This hits the
    # small-problem XLA bypass (Pallas launch would be pure overhead here).
    m, n, batch = 32, 16, 2
    weight = jax.random.normal(kw, (m, n), dtype=jnp.float32)
    x = jax.random.normal(kx, (batch, n), dtype=jnp.float32)
    out = jax.block_until_ready(direction_forward(weight, x))
    ref = _reference_forward(weight, x)
    assert out.shape == ref.shape == (batch, m), (out.shape, ref.shape)
    assert jnp.allclose(out, ref, rtol=1e-2, atol=1e-2)

    # input=None branch: returns Q directly (no Pallas hot path involved).
    Q = jax.block_until_ready(direction_forward(weight, None))
    assert Q.shape == (m, min(m, n)), Q.shape

    # A slightly larger config that exercises the Pallas MXU kernel
    # (bf16 inputs, f32 accumulation, padded lane-dense output tiles).
    m2, n2, batch2 = 256, 144, 48
    weight2 = jax.random.normal(kw2, (m2, n2), dtype=jnp.float32)
    x2 = jax.random.normal(kx2, (batch2, n2), dtype=jnp.float32)
    out2 = jax.block_until_ready(direction_forward(weight2, x2))
    ref2 = _reference_forward(weight2, x2)
    assert out2.shape == ref2.shape == (batch2, m2), (out2.shape, ref2.shape)
    assert jnp.allclose(out2, ref2, rtol=2e-2, atol=2e-2), (
        float(jnp.max(jnp.abs(out2 - ref2))))

    print("KERNEL_OK")
</pallas_src>

<mosaic_0001>
module attributes {stable_mosaic.version = 11 : i64} {
  func.func @_matmul_kernel_single(%arg0: i32, %arg1: i32, %arg2: memref<48x256xbf16, #tpu.memory_space<vmem>>, %arg3: memref<256x128xbf16, #tpu.memory_space<vmem>>, %arg4: memref<48x128xf32, #tpu.memory_space<vmem>>) attributes {dimension_semantics = [#tpu.dimension_semantics<parallel>, #tpu.dimension_semantics<parallel>], iteration_bounds = array<i64: 1, 2>, scalar_prefetch = 0 : i64, scratch_operands = 0 : i64, tpu.core_type = #tpu.core_type<tc>, window_params = [{transform_indices = @transform_0, window_bounds = array<i64: 48, 256>}, {transform_indices = @transform_1, window_bounds = array<i64: 256, 128>}, {transform_indices = @transform_2, window_bounds = array<i64: 48, 128>}]} {
    %c0 = arith.constant 0 : index
    %c0_0 = arith.constant 0 : index
    %0 = vector.load %arg2[%c0, %c0_0] : memref<48x256xbf16, #tpu.memory_space<vmem>>, vector<48x256xbf16>
    %c0_1 = arith.constant 0 : index
    %c0_2 = arith.constant 0 : index
    %1 = vector.load %arg3[%c0_1, %c0_2] : memref<256x128xbf16, #tpu.memory_space<vmem>>, vector<256x128xbf16>
    %cst = arith.constant dense<0.000000e+00> : vector<48x128xf32>
    %2 = tpu.matmul %0, %1, %cst {dimension_numbers = #tpu.dot_dimension_numbers<[1], [0], [0], [1], [0, 0, 1, 1], [], []>} : vector<48x256xbf16>, vector<256x128xbf16>, vector<48x128xf32> -> vector<48x128xf32>
    %c0_3 = arith.constant 0 : index
    %c0_4 = arith.constant 0 : index
    %3 = vector.load %arg4[%c0_3, %c0_4] : memref<48x128xf32, #tpu.memory_space<vmem>>, vector<48x128xf32>
    tpu.vector_store %arg4[%c0_3, %c0_4], %2 {strides = array<i32>} : memref<48x128xf32, #tpu.memory_space<vmem>>, vector<48x128xf32>,
    return
  }
  func.func @transform_0(%arg0: i32, %arg1: i32) -> (i32, i32) {
    %c0_i32 = arith.constant 0 : i32
    %c0_i32_0 = arith.constant 0 : i32
    return %arg0, %c0_i32 : i32, i32
  }
  func.func @transform_1(%arg0: i32, %arg1: i32) -> (i32, i32) {
    %c0_i32 = arith.constant 0 : i32
    %c0_i32_0 = arith.constant 0 : i32
    return %c0_i32, %arg1 : i32, i32
  }
  func.func @transform_2(%arg0: i32, %arg1: i32) -> (i32, i32) {
    %c0_i32 = arith.constant 0 : i32
    return %arg0, %arg1 : i32, i32
  }
}

</mosaic_0001>

<bundles_post_ra>
// kernel: tpu_custom_call.1
= control target key start
LH: loop header
LB: loop body
LE: loop exit
PB: predicated region body
PF: predicated region fallthrough
CT: control target
= control target key end

     0   :  { %7 = vsyncpa [#allocation3], 0  ;;  %s1095_s0 = inlined_call_operand.hbm [shape: bf16[48,256], index: 0, kind: input, shape index: {}]   ;;  %s1096_s1 = inlined_call_operand.hbm [shape: bf16[256,256], index: 1, kind: input, shape index: {}]   ;;  %s1097_s2 = inlined_call_operand.hbm [shape: f32[48,256], index: 2, kind: output, shape index: {}]  }
   0x1   :  { %8 = vsyncpa [#allocation6], 0 }
   0x2   :  { %10 = vsyncpa [#allocation6 + $0x1], 0 }
   0x3   :  { %11 = vsyncpa [#allocation4], 0 }
   0x4   :  { %13 = vsyncpa [#allocation4 + $0x1], 0  ;;  %s898_s9 = smov 0   ;;  %s900_s10 = smov 0  }
   0x5   :  { %s902_s11 = smov 0   ;;  %s904_s12 = smov 0  }
   0x6   :  { %s906_s13 = smov 0   ;;  %s908_s14 = smov 0  }
   0x7 LB: > { %1102 = sst [smem:[#allocation11_spill]] %s871_s14  ;;  %s542_s15 = sadd.s32 4294967295, %s871_s14   ;;  %s871_s14 = sphi %s908_s14, %s1121_s14   ;;  %s867_s13 = sphi %s906_s13, %s1120_s13   ;;  %s863_s12 = sphi %s904_s12, %s1119_s12   ;;  %s859_s11 = sphi %s902_s11, %s1118_s11   ;;  %s855_s10 = sphi %s900_s10, %s1117_s10   ;;  %s851_s9 = sphi %s898_s9, %s1116_s9  }
   0x8   : > { %s543_s16 = sadd.s32 4294967294, %s871_s14   ;;  %p71_p0 = scmp.ne.s32.totalorder %s859_s11, %s855_s10 }
   0x9   : > { %p72_p1 = scmp.eq.s32.totalorder %s871_s14, 0  ;;  %p77_p2 = scmp.ne.s32.totalorder %s855_s10, %s851_s9 }
   0xa   : > { %p935_p3 = scmp.eq.s32.totalorder %s542_s15, 0  ;;  %p103_p5 = scmp.eq.s32.totalorder %s542_s15, 1 }
   0xb   : > { %p939_p4 = por %p72_p1, %p71_p0  ;;  %p109_p7 = scmp.eq.s32.totalorder %s543_s16, 1 }
   0xc   : > { %p945_p6 = por %p935_p3, %p77_p2  ;;  %p949_p8 = por %p103_p5, %p71_p0 }
   0xd   : > { %p544_p9 = scmp.ge.s32.totalorder %s871_s14, 1  ;;  %p954_p10 = por %p109_p7, %p77_p2 }
   0xe   : > { %s1105_s19 = scalar_select %p945_p6, 1, 0 }
   0xf   : > { %s1106_s20 = scalar_select %p949_p8, 1, 0 }
  0x10   : > { %s1107_s21 = scalar_select %p954_p10, 1, 0 }
  0x11   : > { %p116_p11 = scmp.lt.s32.totalorder %s871_s14, 3  ;;  %s873_s23 = smov [#allocation2]  }
  0x12   : > { %s132_s24 = sshll.u32 %s873_s23, 4  ;;  %p649_p1 = scmp.lt.s32.totalorder %s871_s14, 2  ;;  %s133_s24 = int_to_ptr.vmem [resolvable:$true] %s132_s24 }
  0x13   : > { %p959_p12 = pnand %p544_p9, %p116_p11  ;;  %s28_s27 = sadd.s32 1, %s867_s13 }
  0x14   : > { %p975_p2 = pnand %p649_p1, %p939_p4  ;;  %s744_s28 = scalar_lea.vmem %s133_s24, 768 }
  0x15   : > { %p636_p13 = pneg %p959_p12  ;;  %p745_p9 = scmp.ne.s32.totalorder %s133_s24, %s744_s28 }
  0x16   : > { %p752_p0 = scmp.lt.s32.totalorder %s133_s24, %s133_s24  ;;  %p753_p8 = scmp.lt.s32.totalorder %s744_s28, %s744_s28 }
  0x17   : > { %p969_p5 = pnand %p636_p13, %p935_p3 }
  0x18   : > { %p754_p6 = por %p753_p8, %p752_p0 }
  0x19   : > { %p735_p7 = pneg %p969_p5 }
  0x1b   : > { %p747_p11 = pnand %p745_p9, %p735_p7 }
  0x1d   : > { %p748_p10 = pneg %p747_p11 }
  0x1f   : > { %p755_p13 = pnand %p754_p6, %p748_p10 }
  0x21   : > { %758 = shalt.err (!%p755_p13)
}
  0x22   : > { %s874_s29 = smov 128   ;;  %s875_s30 = smov 8  }
  0x23   : > { %639 = dma.hbm_to_vmem [thread:$0]  (!%p969_p5), %s1095_s0, 768, %s133_s24, [#allocation3], %s874_s29, %s874_s29, %s875_s30  }
  0x24   : > { %p29_p4 = scmp.ge.s32.totalorder %s28_s27, 2  ;;  %s64_s5 = sadd.s32 1, %s859_s11 }
  0x25   : > { %s146_s6 = sand.u32 1, %s859_s11   ;;  %s548_s15 = sshll.u32 %s867_s13, 6 }
  0x26   : > { %s1123_s27 = smov (%p29_p4, %s28_s27), 0  ;;  %s547_s7 = sshll.u32 %s146_s6, 7 }
  0x27   : > { %s61_s8 = ssub.s32 %s867_s13, %s1123_s27  ;;  %s155_s23 = scalar_lea.hbm %s1096_s1, %s548_s15 }
  0x28   : > { %p62_p6 = scmp.eq.s32.totalorder %s61_s8, 0  ;;  %s150_s25 = scalar_lea.vmem [#allocation5], %s547_s7 }
  0x29   : > { %s156_s28 = sshll.u32 %s150_s25, 4  ;;  %s147_s24 = scalar_lea.sflag [#allocation6], %s146_s6  ;;  %s157_s28 = int_to_ptr.vmem [resolvable:$true] %s156_s28 }
  0x2a   : > { %s1000_s14 = scalar_select %p62_p6, %s859_s11, %s64_s5  }
  0x2b   : > { %p761_p8 = pneg %p975_p2  ;;  %s772_s30 = scalar_lea.vmem %s157_s28, 2048 }
  0x2c   : > { %p773_p10 = scmp.ne.s32.totalorder %s157_s28, %s772_s30  ;;  %s876_s3 = smov [#allocation5]  }
  0x2d   : > { %s777_s4 = sshll.u32 %s876_s3, 4  ;;  %s778_s4 = int_to_ptr.vmem [resolvable:$false] %s777_s4 }
  0x2e   : > { %p775_p0 = pnand %p773_p10, %p761_p8  ;;  %s779_s8 = scalar_lea.vmem %s778_s4, 4096 }
  0x2f   : > { %p780_p5 = scmp.lt.s32.totalorder %s157_s28, %s778_s4  ;;  %p781_p7 = scmp.lt.s32.totalorder %s779_s8, %s772_s30 }
  0x30   : > { %p776_p1 = pneg %p775_p0 }
  0x31   : > { %p782_p9 = por %p781_p7, %p780_p5 }
  0x33   : > { %p783_p11 = pnand %p782_p9, %p776_p1 }
  0x35   : > { %786 = shalt.err (!%p783_p11)
}
  0x36   : > { %s877_s7 = smov 64   ;;  %s878_s5 = smov 4  }
  0x37   : > { %643 = dma.hbm_to_vmem [thread:$0]  (!%p975_p2), %s155_s23, 2048, %s157_s28, %s147_s24, %s874_s29, %s877_s7, %s878_s5  }
  0x38   : > { %168 = sbr.rel (%p959_p12) target bundleno = 323 (0x143), region = 28 }
  0x3d   : > { %838 = dma.done.wait (%p935_p3), [#allocation3], 768  }
  0x3e   : > { %840 = vsyncadd (%p935_p3), [#allocation3], 4294966528  ;;  %s1014_s6 = sand.u32 1, %s855_s10   ;;  %p1111_p2 = scmp.ne.s32.totalorder %s1105_s19, 0 }
  0x3f   : > { %s551_s15 = sshll.u32 %s1014_s6, 7  ;;  %s175_s16 = scalar_lea.sflag [#allocation6], %s1014_s6 }
  0x40   : > { %s1018_s26 = scalar_lea.vmem [#allocation5], %s551_s15 }
  0x41   : > { %842 = dma.done.wait (%p1111_p2), %s175_s16, 2048  }
  0x42   : > { %844 = vsyncadd (%p1111_p2), %s175_s16, 4294965248  ;;  %v708_v0 = vld [vmem:[%s1018_s26 + $0x78] sm:$0xff]   ;;  %v710_v2 = vld [vmem:[%s1018_s26 + $0x70] sm:$0xff]   ;;  %s627_s17 = smul.u32 48, %s1014_s6  ;;  %s574_s29 = sshll.u32 %s863_s12, 7 }
  0x43   : > { %v709_v1 = vld [vmem:[%s1018_s26 + $0x38] sm:$0xff]   ;;  %611 = vmatprep.subr.bf16.mxu1 %v708_v0  ;;  %577 = vmatprep.subr.bf16.mxu0 %v708_v0  ;;  %v711_v3 = vld [vmem:[%s1018_s26 + $0x30] sm:$0xff]   ;;  %v712_v4 = vld [vmem:[%s1018_s26 + $0x68] sm:$0xff]   ;;  %s1047_s25 = scalar_lea.hbm %s1097_s2, %s574_s29  ;;  %s430_s28 = scalar_lea.sflag [#allocation4], %s1014_s6 }
  0x44   : > { %619 = vmatpush3.bf16.msra.mxu1 %v709_v1  ;;  %578 = vmatpush3.bf16.msra.mxu0 %v709_v1  ;;  %v713_v5 = vld [vmem:[%s1018_s26 + $0x28] sm:$0xff]   ;;  %v714_v6 = vld [vmem:[%s1018_s26 + $0x60] sm:$0xff]   ;;  %v716_v8 = vld [vmem:[%s1018_s26 + $0x58] sm:$0xff]   ;;  %s198_s19 = scalar_lea.vmem [#allocation7], %s627_s17  ;;  %p1112_p12 = scmp.ne.s32.totalorder %s1106_s20, 0 }
  0x45   : > { %612 = vmatprep.subr.bf16.mxu1 %v710_v2  ;;  %579 = vmatprep.subr.bf16.mxu0 %v710_v2  ;;  %v715_v7 = vld [vmem:[%s1018_s26 + $0x20] sm:$0xff]   ;;  %v717_v9 = vld [vmem:[%s1018_s26 + $0x18] sm:$0xff]   ;;  %v718_v10 = vld [vmem:[%s1018_s26 + $0x50] sm:$0xff]   ;;  %s445_s22 = sshll.u32 %s198_s19, 4  ;;  %s879_s12 = smov [#allocation7]   ;;  %s1042_s22 = int_to_ptr.vmem [resolvable:$true] %s445_s22 }
  0x46   : > { %v726_v11 = vld [vmem:[#allocation2 + $0x14] ss:$8 sps:$4 sm:$0xff]   ;;  %v729_v12 = vld [vmem:[#allocation2 + $0x4] ss:$8 sps:$4 sm:$0xff]   ;;  %v724_v18 = vld [vmem:[#allocation2 + $0x10] ss:$8 sps:$4 sm:$0xff]  }
  0x47   : > { %v719_v13 = vld [vmem:[%s1018_s26 + $0x10] sm:$0xff]   ;;  %v720_v14 = vld [vmem:[%s1018_s26 + $0x48] sm:$0xff]   ;;  %406 = vmatprep.mubr.bf16.mxu1 %v726_v11  ;;  %398 = vmatprep.mubr.bf16.mxu0 %v729_v12  ;;  %v722_v16 = vld [vmem:[%s1018_s26 + $0x40] sm:$0xff]   ;;  %s787_s24 = scalar_lea.vmem %s1042_s22, 768  ;;  %s791_s30 = sshll.u32 %s879_s12, 4  ;;  %s792_s30 = int_to_ptr.vmem [resolvable:$false] %s791_s30 }
  0x48   : > { %620 = vmatpush3.bf16.msra.mxu1 %v711_v3  ;;  %580 = vmatpush3.bf16.msra.mxu0 %v711_v3  ;;  %v721_v15 = vld [vmem:[%s1018_s26 + $0x8] sm:$0xff]   ;;  %v723_v17 = vld [vmem:[%s1018_s26] sm:$0xff]   ;;  %v727_v19 = vld [vmem:[#allocation2] ss:$8 sps:$4 sm:$0xff]   ;;  %p788_p3 = scmp.ne.s32.totalorder %s1042_s22, %s787_s24  ;;  %s793_s3 = scalar_lea.vmem %s792_s30, 1536 }
  0x49   : > { %613 = vmatprep.subr.bf16.mxu1 %v712_v4  ;;  %581 = vmatprep.subr.bf16.mxu0 %v712_v4  ;;  %v730_v20 = vld [vmem:[#allocation2 + $0x24] ss:$8 sps:$4 sm:$0xff]   ;;  %v732_v21 = vld [vmem:[#allocation2 + $0x20] ss:$8 sps:$4 sm:$0xff]   ;;  %p794_p6 = scmp.lt.s32.totalorder %s1042_s22, %s792_s30  ;;  %p795_p8 = scmp.lt.s32.totalorder %s793_s3, %s787_s24 }
  0x4a   : > { %p789_p13 = pnand %p788_p3, %p1112_p12 }
  0x4b   : > { %p796_p10 = por %p795_p8, %p794_p6 }
  0x4c   : > { %621 = vmatpush3.bf16.msra.mxu1 %v713_v5  ;;  %582 = vmatpush3.bf16.msra.mxu0 %v713_v5  ;;  %p790_p4 = pneg %p789_p13 }
  0x4d   : > { %614 = vmatprep.subr.bf16.mxu1 %v714_v6  ;;  %583 = vmatprep.subr.bf16.mxu0 %v714_v6 }
  0x4e   : > { %p797_p0 = pnand %p796_p10, %p790_p4 }
  0x50   : > { %622 = vmatpush3.bf16.msra.mxu1 %v715_v7  ;;  %584 = vmatpush3.bf16.msra.mxu0 %v715_v7 }
  0x51   : > { %615 = vmatprep.subr.bf16.mxu1 %v716_v8  ;;  %585 = vmatprep.subr.bf16.mxu0 %v716_v8 }
  0x54   : > { %623 = vmatpush3.bf16.msra.mxu1 %v717_v9  ;;  %586 = vmatpush3.bf16.msra.mxu0 %v717_v9 }
  0x55   : > { %616 = vmatprep.subr.bf16.mxu1 %v718_v10  ;;  %587 = vmatprep.subr.bf16.mxu0 %v718_v10 }
  0x58   : > { %624 = vmatpush3.bf16.msra.mxu1 %v719_v13  ;;  %588 = vmatpush3.bf16.msra.mxu0 %v719_v13 }
  0x59   : > { %617 = vmatprep.subr.bf16.mxu1 %v720_v14  ;;  %589 = vmatprep.subr.bf16.mxu0 %v720_v14 }
  0x5c   : > { %625 = vmatpush3.bf16.msra.mxu1 %v721_v15  ;;  %590 = vmatpush3.bf16.msra.mxu0 %v721_v15 }
  0x5d   : > { %618 = vmatprep.subr.bf16.mxu1 %v722_v16  ;;  %591 = vmatprep.subr.bf16.mxu0 %v722_v16 }
  0x60   : > { %626 = vmatpush3.bf16.msra.mxu1 %v723_v17  ;;  %592 = vmatpush3.bf16.msra.mxu0 %v723_v17 }
  0x63   : > { %407 = vmatmul.mubr.bf16.vlgmr.msra.gmra.mxu1 %v724_v18  ;;  %399 = vmatmul.mubr.bf16.vlgmr.msra.gmra.mxu0 %v727_v19 }
  0x64   : > { %414 = vmatprep.mubr.bf16.mxu1 %v730_v20 }
  0x6b   : > { %415 = vmatmul.mubr.bf16.gmra.mxu1 %v732_v21 }
 0x123   : > { %v599_v22 = vpop.f32.mrf.mxu1  ;;  %v593_v23 = vpop.f32.mrf.mxu0 }
 0x125   : > { %v600_v24 = vpop.f32.mrf.mxu1  ;;  %v594_v25 = vpop.f32.mrf.mxu0 }
 0x126   : > { %v601_v26 = vadd.f32 %v600_v24, %v599_v22  ;;  %v595_v27 = vadd.f32 %v594_v25, %v593_v23 }
 0x127   : > { %v602_v28 = vpop.f32.mrf.mxu1  ;;  %v596_v29 = vpop.f32.mrf.mxu0 }
 0x128   : > { %425 = vst [vmem:[%s198_s19 + $0x10] sm:$0xff] %v601_v26  ;;  %423 = vst [vmem:[%s198_s19] sm:$0xff] %v595_v27 }
 0x129   : > { %v603_v30 = vpop.f32.mrf.mxu1  ;;  %v597_v31 = vpop.f32.mrf.mxu0 }
 0x12a   : > { %v604_v32 = vadd.f32 %v603_v30, %v602_v28  ;;  %v598_v33 = vadd.f32 %v597_v31, %v596_v29 }
 0x12b   : > { %v605_v34 = vpop.f32.mrf.mxu1 }
 0x12c   : > { %426 = vst [vmem:[%s198_s19 + $0x18] sm:$0xff] %v604_v32  ;;  %424 = vst [vmem:[%s198_s19 + $0x8] sm:$0xff] %v598_v33 }
 0x12d   : > { %v606_v35 = vpop.f32.mrf.mxu1 }
 0x12e   : > { %v607_v36 = vadd.f32 %v606_v35, %v605_v34 }
 0x12f   : > { %v608_v37 = vpop.f32.mrf.mxu1 }
 0x130   : > { %427 = vst [vmem:[%s198_s19 + $0x20] sm:$0xff] %v607_v36 }
 0x131   : > { %v609_v38 = vpop.f32.mrf.mxu1 }
 0x132   : > { %v610_v39 = vadd.f32 %v609_v38, %v608_v37 }
 0x134   : > { %428 = vst [vmem:[%s198_s19 + $0x28] sm:$0xff] %v610_v39 }
 0x135   : > { %800 = shalt.err (!%p797_p0)
}
 0x136   : > { %s801_s4 = scalar_lea.hbm %s1047_s25, 768  ;;  %s805_s5 = scalar_lea.hbm %s1097_s2, 1536 }
 0x137   : > { %p802_p1 = scmp.ne.s32.totalorder %s1047_s25, %s801_s4  ;;  %p806_p9 = scmp.lt.s32.totalorder %s1047_s25, %s1097_s2 }
 0x138   : > { %p807_p11 = scmp.lt.s32.totalorder %s805_s5, %s801_s4 }
 0x139   : > { %p803_p5 = pnand %p802_p1, %p1112_p12 }
 0x13a   : > { %p808_p2 = por %p807_p11, %p806_p9 }
 0x13b   : > { %p804_p7 = pneg %p803_p5 }
 0x13d   : > { %p809_p3 = pnand %p808_p2, %p804_p7 }
 0x13f   : > { %812 = shalt.err (!%p809_p3)
}
 0x140   : > { %s880_s26 = smov 128   ;;  %s881_s17 = smov 256  }
 0x141   : > { %s882_s19 = smov 8  }
 0x142   : > { %634 = dma.vmem_to_hbm [thread:$0]  (%p1112_p12), %s1042_s22, 768, %s1047_s25, %s430_s28, %s880_s26, %s881_s17, %s882_s19  }
 0x143 PF: > { %s1113_s29 = sld [smem:[#allocation11_spill]]  ;;  %s460_s18 = sand.u32 1, %s851_s9  }
 0x144   : > { %p1114_p13 = scmp.ne.s32.totalorder %s1107_s21, 0  ;;  %s461_s23 = scalar_lea.sflag [#allocation4], %s460_s18 }
 0x149   : > { %p1115_p4 = scmp.ge.s32.totalorder %s1113_s29, 2 }
 0x14b   : > { %p645_p6 = pnand %p1115_p4, %p1114_p13 }
 0x14d   : > { %p646_p8 = pneg %p645_p6 }
 0x14f   : > { %846 = dma.done.wait (%p646_p8), %s461_s23, 768  }
 0x150   : > { %848 = vsyncadd (%p646_p8), %s461_s23, 4294966528  ;;  %s19_s24 = sadd.s32 1, %s1113_s29   ;;  %s1116_s9 = smov %s855_s10 }
 0x151   : > { %p16_p10 = scmp.ge.s32.totalorder %s19_s24, 4   ;;  %s1117_s10 = smov %s859_s11 }
 0x152   : > { %s1118_s11 = smov %s1000_s14  ;;  %s1119_s12 = smov %s867_s13 }
 0x153   : > { %s1120_s13 = smov %s1123_s27  ;;  %s1121_s14 = smov %s19_s24 }
 0x154   :  { %18 = sbr.rel (!%p16_p10) target bundleno = 7 (0x7), region = 79 }
 0x159   :  { %466 = vsyncpa [#allocation3], 1 }
 0x15a   :  { %468 = vsyncpa [#allocation3 + $0x1], 1 }
 0x15b   :  { %469 = vsyncpa [#allocation6], 1 }
 0x15c   :  { %471 = vsyncpa [#allocation6 + $0x1], 1 }
 0x15d   :  { %472 = vsyncpa [#allocation4], 1 }
 0x15e   :  { %474 = vsyncpa [#allocation4 + $0x1], 1 }

</bundles_post_ra>
